<compile_context>
chip_gen: v7x
topology: tpu7x:2x2x1
jax: 0.10.0
libtpu: 0.0.40
codegen_flags: <defaults>
</compile_context>

<pallas_src>
import math

import jax
import jax.numpy as jnp
from jax import lax
from jax.experimental import pallas as pl
from jax.experimental.pallas import tpu as pltpu

_EPS = 1e-5


def _round_up(x, m):
    return ((x + m - 1) // m) * m


def _pad_feature(d):
    # Hidden feature dims: at least one full 128-lane vreg; multiples of 256
    # above that so both halves of the 256-wide MXU (v6e / v7x) are fed.
    if d <= 128:
        return 128
    return _round_up(d, 256)


def _pad2d(a, rows, cols):
    r, c = a.shape
    if r == rows and c == cols:
        return a
    return jnp.pad(a, ((0, rows - r), (0, cols - c)))


def _pad_row(v, width):
    v = v.reshape(-1)
    d = v.shape[0]
    if d == width:
        return v
    return jnp.pad(v, (0, width - d))


# ------------------------------ fused kernel ------------------------------- #

def _make_fused_mlp_kernel(dims, d_pads, last_norm):
    """(Linear -> BN -> ReLU)* -> Linear [-> LN], fully fused.

    Weights arrive lane-padded bf16; all gamma/beta/bias rows arrive stacked
    in a single f32 [n_vecs, maxd] array.  Intermediate activations never
    leave on-chip memory.
    """
    n_linear = len(dims) - 1
    n_hidden = n_linear - 1

    def kernel(*refs):
        x_ref = refs[0]
        w_refs = refs[1:1 + n_linear]
        vecs = refs[1 + n_linear][...]          # [n_vecs, maxd] f32 (tiny)
        o_ref = refs[-1]

        h = x_ref[...]                          # [n, d0] f32
        vidx = 0
        for i in range(n_linear):
            w = w_refs[i][...]                  # bf16, lane-padded
            # bf16 MXU matmul, f32 accumulation.
            y = jnp.dot(h.astype(jnp.bfloat16), w,
                        preferred_element_type=jnp.float32)

            if i < n_hidden:
                dp = d_pads[i + 1]
                g = vecs[vidx:vidx + 1, :dp]
                beta = vecs[vidx + 1:vidx + 2, :dp]
                vidx += 2
                # NOTE: hidden Linear bias is cancelled by training-mode BN's
                # batch-mean subtraction -> not stored / not added.
                mean = jnp.mean(y, axis=0, keepdims=True)
                d = y - mean
                var = jnp.mean(d * d, axis=0, keepdims=True)
                y = d * lax.rsqrt(var + _EPS) * g + beta
                h = jnp.maximum(y, 0.0)
                # Padded feature lanes stay exactly 0 (w / gamma / beta are
                # zero-padded), so they never perturb later layers.
            else:
                d_out = dims[-1]
                b = vecs[vidx:vidx + 1, :d_out]
                vidx += 1
                y = y + b
                if last_norm:
                    g = vecs[vidx:vidx + 1, :d_out]
                    beta = vecs[vidx + 1:vidx + 2, :d_out]
                    vidx += 2
                    mean = jnp.mean(y, axis=-1, keepdims=True)
                    d = y - mean
                    var = jnp.mean(d * d, axis=-1, keepdims=True)
                    y = d * lax.rsqrt(var + _EPS) * g + beta
                h = y

        o_ref[...] = h

    return kernel


# --------------------------- one-time param packing ------------------------- #

def prepare_mlp_params(params, last_norm=False):
    """Pad / pack / bf16-cast parameters ONCE; reuse for every forward call."""
    n_linear = len(params)
    n_hidden = n_linear - 1
    dims = [params[0]["w"].shape[0]] + [p["w"].shape[1] for p in params]

    # Only hidden feature dims are padded; x enters and the output leaves the
    # kernel with their true shapes (no pre-pad / post-slice XLA ops).
    d_pads = [dims[0]] + [_pad_feature(d) for d in dims[1:-1]] + [dims[-1]]

    ws = []
    for i, p in enumerate(params):
        ws.append(_pad2d(p["w"], d_pads[i], d_pads[i + 1]).astype(jnp.bfloat16))

    vec_rows = []
    for i in range(n_hidden):
        vec_rows.append(params[i]["gamma"])
        vec_rows.append(params[i]["beta"])
    vec_rows.append(params[-1]["b"])
    if last_norm:
        vec_rows.append(params[-1]["gamma"])
        vec_rows.append(params[-1]["beta"])
    maxd = max(d_pads[1:])
    vecs = jnp.stack([_pad_row(v, maxd) for v in vec_rows]).astype(jnp.float32)

    return {
        "ws": ws,
        "vecs": vecs,
        "dims": dims,
        "d_pads": d_pads,
        "last_norm": last_norm,
    }


# ------------------------------ pallas wrapper ------------------------------ #

def mlp_forward_pallas(packed, x):
    dims = packed["dims"]
    d_pads = packed["d_pads"]
    last_norm = packed["last_norm"]
    ws = packed["ws"]
    vecs = packed["vecs"]
    n_linear = len(ws)
    n_hidden = n_linear - 1
    n = x.shape[0]

    kernel = _make_fused_mlp_kernel(dims, d_pads, last_norm)
    args = [x.astype(jnp.float32)] + list(ws) + [vecs]

    # Accurate (unpadded) cost estimate.
    flops = 2 * n * sum(dims[i] * dims[i + 1] for i in range(n_linear))
    transcendentals = sum(dims[i + 1] for i in range(n_hidden)) + (n if last_norm else 0)
    bytes_accessed = int(
        sum(int(a.size) * a.dtype.itemsize for a in args) + 4 * n * dims[-1]
    )

    # VMEM budget: everything resident (inputs + output + activation temps),
    # bounded so it stays safe on v7x's 64 MiB physical VMEM.
    work_bytes = 6 * n * max(d_pads) * 4
    need = bytes_accessed + work_bytes
    vmem_limit = int(min(max(2 * need, 32 * 1024 * 1024), 64 * 1024 * 1024))

    out = pl.pallas_call(
        kernel,
        out_shape=jax.ShapeDtypeStruct((n, dims[-1]), jnp.float32),
        in_specs=[pl.BlockSpec(memory_space=pltpu.MemorySpace.VMEM) for _ in args],
        out_specs=pl.BlockSpec(memory_space=pltpu.MemorySpace.VMEM),
        compiler_params=pltpu.CompilerParams(vmem_limit_bytes=vmem_limit),
        cost_estimate=pl.CostEstimate(
            flops=flops,
            transcendentals=transcendentals,
            bytes_accessed=bytes_accessed,
        ),
    )(*args)
    return out


# ----------------------------- params & reference --------------------------- #

def _xavier_uniform(key, fan_in, fan_out):
    bound = math.sqrt(6.0 / (fan_in + fan_out))
    # Stored as [fan_in, fan_out] (transpose of torch's [out, in]); the xavier
    # bound is symmetric in fan_in/fan_out so the distribution matches.
    return jax.random.uniform(
        key, (fan_in, fan_out), dtype=jnp.float32, minval=-bound, maxval=bound
    )


def init_mlp_params(key, dims, last_norm=False):
    params = []
    n_linear = len(dims) - 1
    keys = jax.random.split(key, n_linear)
    for i in range(n_linear):
        d_in, d_out = dims[i], dims[i + 1]
        layer = {
            "w": _xavier_uniform(keys[i], d_in, d_out),
            "b": jnp.zeros((1, d_out), jnp.float32),
        }
        is_hidden = i < len(dims) - 2
        if is_hidden or last_norm:
            layer["gamma"] = jnp.ones((1, d_out), jnp.float32)
            layer["beta"] = jnp.zeros((1, d_out), jnp.float32)
        params.append(layer)
    return params


def mlp_reference(params, x, last_norm=False, matmul_dtype=jnp.float32):
    """Pure-JAX reference mirroring torch training-mode semantics.

    matmul_dtype=jnp.bfloat16 mirrors the kernel's MXU precision exactly.
    """
    n_layers = len(params)
    h = x
    for i, p in enumerate(params):
        y = jnp.dot(h.astype(matmul_dtype), p["w"].astype(matmul_dtype),
                    preferred_element_type=jnp.float32) + p["b"]
        if i < n_layers - 1:
            mean = jnp.mean(y, axis=0, keepdims=True)
            var = jnp.mean((y - mean) ** 2, axis=0, keepdims=True)
            y = (y - mean) * lax.rsqrt(var + _EPS) * p["gamma"] + p["beta"]
            y = jnp.maximum(y, 0.0)
        elif last_norm:
            mean = jnp.mean(y, axis=-1, keepdims=True)
            var = jnp.mean((y - mean) ** 2, axis=-1, keepdims=True)
            y = (y - mean) * lax.rsqrt(var + _EPS) * p["gamma"] + p["beta"]
        h = y
    return h


# --------------------------------- main ------------------------------------- #

if __name__ == "__main__":
    key = jax.random.PRNGKey(0)
    k_param, k_param2, k_x = jax.random.split(key, 3)

    batch = 8
    dims = [32, 64, 48, 16]          # MLP([32, 64, 48, 16])
    x = jax.random.normal(k_x, (batch, dims[0]), dtype=jnp.float32)

    # Config 1: default (last_norm=False)
    params = init_mlp_params(k_param, dims, last_norm=False)
    packed = prepare_mlp_params(params, last_norm=False)      # one-time packing
    out = jax.block_until_ready(mlp_forward_pallas(packed, x))
    ref_bf16 = mlp_reference(params, x, last_norm=False, matmul_dtype=jnp.bfloat16)
    ref_f32 = mlp_reference(params, x, last_norm=False, matmul_dtype=jnp.float32)
    assert out.shape == (batch, dims[-1])
    assert jnp.allclose(out, ref_bf16, atol=2e-3, rtol=2e-3), "mismatch vs bf16 ref"
    assert jnp.allclose(out, ref_f32, atol=1e-1, rtol=1e-1), "mismatch vs f32 ref"

    # Config 2: last_norm=True (exercises the fused LayerNorm tail)
    params_ln = init_mlp_params(k_param2, dims, last_norm=True)
    packed_ln = prepare_mlp_params(params_ln, last_norm=True)
    out_ln = jax.block_until_ready(mlp_forward_pallas(packed_ln, x))
    ref_ln_bf16 = mlp_reference(params_ln, x, last_norm=True, matmul_dtype=jnp.bfloat16)
    ref_ln_f32 = mlp_reference(params_ln, x, last_norm=True, matmul_dtype=jnp.float32)
    assert out_ln.shape == (batch, dims[-1])
    assert jnp.allclose(out_ln, ref_ln_bf16, atol=2e-3, rtol=2e-3), "mismatch LN vs bf16 ref"
    assert jnp.allclose(out_ln, ref_ln_f32, atol=1e-1, rtol=1e-1), "mismatch LN vs f32 ref"

    # Config 3: batch not a multiple of 8 (BN stats over the true, unpadded batch)
    x5 = jax.random.normal(jax.random.PRNGKey(7), (5, dims[0]), dtype=jnp.float32)
    out5 = jax.block_until_ready(mlp_forward_pallas(packed_ln, x5))
    ref5_bf16 = mlp_reference(params_ln, x5, last_norm=True, matmul_dtype=jnp.bfloat16)
    assert out5.shape == (5, dims[-1])
    assert jnp.allclose(out5, ref5_bf16, atol=2e-3, rtol=2e-3), "mismatch (batch=5)"

    print("KERNEL_OK")
</pallas_src>

<mosaic_0001>
module attributes {stable_mosaic.version = 11 : i64} {
  func.func @kernel(%arg0: memref<8x32xf32, #tpu.memory_space<vmem>>, %arg1: memref<32x128xbf16, #tpu.memory_space<vmem>>, %arg2: memref<128x128xbf16, #tpu.memory_space<vmem>>, %arg3: memref<128x16xbf16, #tpu.memory_space<vmem>>, %arg4: memref<5x128xf32, #tpu.memory_space<vmem>>, %arg5: memref<8x16xf32, #tpu.memory_space<vmem>>) attributes {dimension_semantics = [], scalar_prefetch = 0 : i64, scratch_operands = 0 : i64, tpu.core_type = #tpu.core_type<tc>} {
    %c0 = arith.constant 0 : index
    %c0_0 = arith.constant 0 : index
    %0 = vector.load %arg4[%c0, %c0_0] : memref<5x128xf32, #tpu.memory_space<vmem>>, vector<5x128xf32>
    %c0_1 = arith.constant 0 : index
    %c0_2 = arith.constant 0 : index
    %1 = vector.load %arg0[%c0_1, %c0_2] : memref<8x32xf32, #tpu.memory_space<vmem>>, vector<8x32xf32>
    %c0_3 = arith.constant 0 : index
    %c0_4 = arith.constant 0 : index
    %2 = vector.load %arg1[%c0_3, %c0_4] : memref<32x128xbf16, #tpu.memory_space<vmem>>, vector<32x128xbf16>
    %3 = arith.truncf %1 : vector<8x32xf32> to vector<8x32xbf16>
    %cst = arith.constant dense<0.000000e+00> : vector<8x128xf32>
    %4 = tpu.matmul %3, %2, %cst {dimension_numbers = #tpu.dot_dimension_numbers<[1], [0], [0], [1], [0, 0, 1, 1], [], []>} : vector<8x32xbf16>, vector<32x128xbf16>, vector<8x128xf32> -> vector<8x128xf32>
    %5 = vector.extract_strided_slice %0 {offsets = [0, 0], sizes = [1, 128], strides = [1, 1]} : vector<5x128xf32> to vector<1x128xf32>
    %6 = vector.extract_strided_slice %0 {offsets = [1, 0], sizes = [1, 128], strides = [1, 1]} : vector<5x128xf32> to vector<1x128xf32>
    %cst_5 = arith.constant dense<0.000000e+00> : vector<128xf32>
    %7 = vector.multi_reduction <add>, %4, %cst_5 [0] : vector<8x128xf32> to vector<128xf32>
    %8 = vector.shape_cast %7 : vector<128xf32> to vector<1x128xf32>
    %cst_6 = arith.constant 8.000000e+00 : f32
    %9 = vector.broadcast %cst_6 : f32 to vector<1x128xf32>
    %10 = arith.divf %8, %9 : vector<1x128xf32>
    %11 = vector.broadcast %10 : vector<1x128xf32> to vector<8x128xf32>
    %12 = arith.subf %4, %11 : vector<8x128xf32>
    %13 = arith.mulf %12, %12 : vector<8x128xf32>
    %cst_7 = arith.constant dense<0.000000e+00> : vector<128xf32>
    %14 = vector.multi_reduction <add>, %13, %cst_7 [0] : vector<8x128xf32> to vector<128xf32>
    %15 = vector.shape_cast %14 : vector<128xf32> to vector<1x128xf32>
    %cst_8 = arith.constant 8.000000e+00 : f32
    %16 = vector.broadcast %cst_8 : f32 to vector<1x128xf32>
    %17 = arith.divf %15, %16 : vector<1x128xf32>
    %cst_9 = arith.constant 9.99999974E-6 : f32
    %18 = vector.broadcast %cst_9 : f32 to vector<1x128xf32>
    %19 = arith.addf %17, %18 : vector<1x128xf32>
    %20 = math.rsqrt %19 : vector<1x128xf32>
    %21 = vector.broadcast %20 : vector<1x128xf32> to vector<8x128xf32>
    %22 = arith.mulf %12, %21 : vector<8x128xf32>
    %23 = vector.broadcast %5 : vector<1x128xf32> to vector<8x128xf32>
    %24 = arith.mulf %22, %23 : vector<8x128xf32>
    %25 = vector.broadcast %6 : vector<1x128xf32> to vector<8x128xf32>
    %26 = arith.addf %24, %25 : vector<8x128xf32>
    %cst_10 = arith.constant 0.000000e+00 : f32
    %27 = vector.broadcast %cst_10 : f32 to vector<8x128xf32>
    %28 = arith.maximumf %26, %27 : vector<8x128xf32>
    %c0_11 = arith.constant 0 : index
    %c0_12 = arith.constant 0 : index
    %29 = vector.load %arg2[%c0_11, %c0_12] : memref<128x128xbf16, #tpu.memory_space<vmem>>, vector<128x128xbf16>
    %30 = arith.truncf %28 : vector<8x128xf32> to vector<8x128xbf16>
    %cst_13 = arith.constant dense<0.000000e+00> : vector<8x128xf32>
    %31 = tpu.matmul %30, %29, %cst_13 {dimension_numbers = #tpu.dot_dimension_numbers<[1], [0], [0], [1], [0, 0, 1, 1], [], []>} : vector<8x128xbf16>, vector<128x128xbf16>, vector<8x128xf32> -> vector<8x128xf32>
    %32 = vector.extract_strided_slice %0 {offsets = [2, 0], sizes = [1, 128], strides = [1, 1]} : vector<5x128xf32> to vector<1x128xf32>
    %33 = vector.extract_strided_slice %0 {offsets = [3, 0], sizes = [1, 128], strides = [1, 1]} : vector<5x128xf32> to vector<1x128xf32>
    %cst_14 = arith.constant dense<0.000000e+00> : vector<128xf32>
    %34 = vector.multi_reduction <add>, %31, %cst_14 [0] : vector<8x128xf32> to vector<128xf32>
    %35 = vector.shape_cast %34 : vector<128xf32> to vector<1x128xf32>
    %cst_15 = arith.constant 8.000000e+00 : f32
    %36 = vector.broadcast %cst_15 : f32 to vector<1x128xf32>
    %37 = arith.divf %35, %36 : vector<1x128xf32>
    %38 = vector.broadcast %37 : vector<1x128xf32> to vector<8x128xf32>
    %39 = arith.subf %31, %38 : vector<8x128xf32>
    %40 = arith.mulf %39, %39 : vector<8x128xf32>
    %cst_16 = arith.constant dense<0.000000e+00> : vector<128xf32>
    %41 = vector.multi_reduction <add>, %40, %cst_16 [0] : vector<8x128xf32> to vector<128xf32>
    %42 = vector.shape_cast %41 : vector<128xf32> to vector<1x128xf32>
    %cst_17 = arith.constant 8.000000e+00 : f32
    %43 = vector.broadcast %cst_17 : f32 to vector<1x128xf32>
    %44 = arith.divf %42, %43 : vector<1x128xf32>
    %cst_18 = arith.constant 9.99999974E-6 : f32
    %45 = vector.broadcast %cst_18 : f32 to vector<1x128xf32>
    %46 = arith.addf %44, %45 : vector<1x128xf32>
    %47 = math.rsqrt %46 : vector<1x128xf32>
    %48 = vector.broadcast %47 : vector<1x128xf32> to vector<8x128xf32>
    %49 = arith.mulf %39, %48 : vector<8x128xf32>
    %50 = vector.broadcast %32 : vector<1x128xf32> to vector<8x128xf32>
    %51 = arith.mulf %49, %50 : vector<8x128xf32>
    %52 = vector.broadcast %33 : vector<1x128xf32> to vector<8x128xf32>
    %53 = arith.addf %51, %52 : vector<8x128xf32>
    %cst_19 = arith.constant 0.000000e+00 : f32
    %54 = vector.broadcast %cst_19 : f32 to vector<8x128xf32>
    %55 = arith.maximumf %53, %54 : vector<8x128xf32>
    %c0_20 = arith.constant 0 : index
    %c0_21 = arith.constant 0 : index
    %56 = vector.load %arg3[%c0_20, %c0_21] : memref<128x16xbf16, #tpu.memory_space<vmem>>, vector<128x16xbf16>
    %57 = arith.truncf %55 : vector<8x128xf32> to vector<8x128xbf16>
    %cst_22 = arith.constant dense<0.000000e+00> : vector<8x16xf32>
    %58 = tpu.matmul %57, %56, %cst_22 {dimension_numbers = #tpu.dot_dimension_numbers<[1], [0], [0], [1], [0, 0, 1, 1], [], []>} : vector<8x128xbf16>, vector<128x16xbf16>, vector<8x16xf32> -> vector<8x16xf32>
    %59 = vector.extract_strided_slice %0 {offsets = [4, 0], sizes = [1, 16], strides = [1, 1]} : vector<5x128xf32> to vector<1x16xf32>
    %60 = vector.broadcast %59 : vector<1x16xf32> to vector<8x16xf32>
    %61 = arith.addf %58, %60 : vector<8x16xf32>
    %c0_23 = arith.constant 0 : index
    %c0_24 = arith.constant 0 : index
    %62 = vector.load %arg5[%c0_23, %c0_24] : memref<8x16xf32, #tpu.memory_space<vmem>>, vector<8x16xf32>
    tpu.vector_store %arg5[%c0_23, %c0_24], %61 {strides = array<i32>} : memref<8x16xf32, #tpu.memory_space<vmem>>, vector<8x16xf32>,
    return
  }
}

</mosaic_0001>

<bundles_post_ra>
// kernel: tpu_custom_call.1
= control target key start
LH: loop header
LB: loop body
LE: loop exit
PB: predicated region body
PF: predicated region fallthrough
CT: control target
= control target key end

     0   :  { %10 = vsyncpa [#allocation3], 0  ;;  %s752_s0 = inlined_call_operand.vmem [shape: f32[8,32], index: 0, kind: input, shape index: {}]   ;;  %s753_s1 = inlined_call_operand.hbm [shape: bf16[32,128], index: 1, kind: input, shape index: {}]   ;;  %s754_s2 = inlined_call_operand.vmem [shape: bf16[128,128], index: 2, kind: input, shape index: {}]   ;;  %s755_s3 = inlined_call_operand.vmem [shape: bf16[128,16], index: 3, kind: input, shape index: {}]   ;;  %s756_s4 = inlined_call_operand.hbm [shape: f32[5,128], index: 4, kind: input, shape index: {}]   ;;  %s757_s5 = inlined_call_operand.hbm [shape: f32[8,16], index: 5, kind: output, shape index: {}]  }
   0x1   :  { %11 = vsyncpa [#allocation6], 0 }
   0x2   :  { %12 = vsyncpa [#allocation4], 0  ;;  %s593_s18 = smov [#allocation2]   ;;  %s521_s22 = scalar_lea.hbm %s753_s1, 256 }
   0x3   :  { %s20_s19 = sshll.u32 %s593_s18, 4  ;;  %p522_p0 = scmp.ne.s32.totalorder %s753_s1, %s521_s22  ;;  %s21_s19 = int_to_ptr.vmem [resolvable:$true] %s20_s19 }
   0x4   :  { %p525_p1 = scmp.lt.u32.totalorder %s521_s22, %s753_s1 }
   0x6   :  { %p527_p2 = pnand %p525_p1, %p522_p0 }
   0x8   :  { %530 = shalt.err (!%p527_p2)
}
   0x9   :  { %s531_s27 = scalar_lea.vmem %s21_s19, 256  ;;  %p536_p4 = scmp.lt.s32.totalorder %s21_s19, %s21_s19 }
   0xa   :  { %p532_p3 = scmp.ne.s32.totalorder %s21_s19, %s531_s27  ;;  %p537_p5 = scmp.lt.s32.totalorder %s531_s27, %s531_s27 }
   0xc   :  { %p538_p6 = por %p537_p5, %p536_p4 }
   0xe   :  { %p539_p7 = pnand %p538_p6, %p532_p3 }
  0x10   :  { %542 = shalt.err (!%p539_p7)
}
  0x11   :  { %s594_s28 = smov 64   ;;  %s595_s29 = smov 4  }
  0x12   :  { %26 = dma.hbm_to_vmem [thread:$0]  %s753_s1, 256, %s21_s19, [#allocation3], %s594_s28, %s594_s28, %s595_s29  }
  0x13   :  { %s596_s7 = smov [#allocation5]   ;;  %s543_s11 = scalar_lea.hbm %s756_s4, 128 }
  0x14   :  { %s37_s8 = sshll.u32 %s596_s7, 4  ;;  %p544_p8 = scmp.ne.s32.totalorder %s756_s4, %s543_s11  ;;  %s38_s8 = int_to_ptr.vmem [resolvable:$true] %s37_s8 }
  0x15   :  { %p547_p9 = scmp.lt.u32.totalorder %s543_s11, %s756_s4 }
  0x17   :  { %p549_p10 = pnand %p547_p9, %p544_p8 }
  0x19   :  { %552 = shalt.err (!%p549_p10)
}
  0x1a   :  { %s553_s16 = scalar_lea.vmem %s38_s8, 128  ;;  %p558_p12 = scmp.lt.s32.totalorder %s38_s8, %s38_s8 }
  0x1b   :  { %p554_p11 = scmp.ne.s32.totalorder %s38_s8, %s553_s16  ;;  %p559_p13 = scmp.lt.s32.totalorder %s553_s16, %s553_s16 }
  0x1d   :  { %p560_p0 = por %p559_p13, %p558_p12 }
  0x1f   :  { %p561_p1 = pnand %p560_p0, %p554_p11 }
  0x21   :  { %564 = shalt.err (!%p561_p1)
}
  0x22   :  { %40 = dma.hbm_to_vmem [thread:$0]  %s756_s4, 128, %s38_s8, [#allocation6]  }
  0x23   :  { %587 = dma.done.wait [#allocation3], 256  }
  0x24   :  { %588 = vsyncadd [#allocation3], 4294967040 }
  0x25   :  { %589 = dma.done.wait [#allocation6], 128  }
  0x26   :  { %590 = vsyncadd [#allocation6], 4294967168  ;;  %v597_v0 = vmov 0.0   ;;  %vm598_vm0 = vmmov 0   ;;  %v499_v1 = vld [vmem:[#allocation2] sm:$0xff]   ;;  %v500_v2 = vld [vmem:[#allocation2 + $0x8] sm:$0xff]   ;;  %v131_v33 = vlaneseq }
  0x27   :  { %444 = vmatprep.subr.bf16.mxu0 %v597_v0  ;;  %448 = vmatprep.mubr.msk.bf16.mxu0 %vm598_vm0, %v597_v0  ;;  %v49_v3 = vld [vmem:[%s752_s0] sm:$0xff]  ;;  %vm67_vm1 = vcmask 261120   ;;  %v502_v6 = vld [vmem:[%s754_s2 + $0x8] sm:$0xff]   ;;  %v503_v7 = vld [vmem:[%s754_s2 + $0x10] sm:$0xff]   ;;  %vm386_vm2 = vcmask 130048  }
  0x28   :  { %452 = vmatprep.subr.bf16.mxu1 %v597_v0  ;;  %468 = vmatprep.mubr.msk.bf16.mxu1 %vm598_vm0, %v597_v0  ;;  %v54_v4 = vpack.c.bf16 %v49_v3, %v49_v3  ;;  %v501_v5 = vld [vmem:[%s754_s2] sm:$0xff]   ;;  %v504_v8 = vld [vmem:[%s754_s2 + $0x18] sm:$0xff]   ;;  %v506_v10 = vld [vmem:[%s754_s2 + $0x28] sm:$0xff]   ;;  %v695_v35 = vshrl.u32 %v131_v33, 7 }
  0x29   :  { %445 = vmatpush3.bf16.msra.mxu0 %v499_v1  ;;  %453 = vmatpush3.bf16.msra.mxu1 %v501_v5  ;;  %v505_v9 = vld [vmem:[%s754_s2 + $0x20] sm:$0xff]   ;;  %v507_v11 = vld [vmem:[%s754_s2 + $0x30] sm:$0xff]   ;;  %v508_v12 = vld [vmem:[%s754_s2 + $0x38] sm:$0xff]  }
  0x2a   :  { %446 = vmatprep.subr.bf16.mxu0 %v597_v0  ;;  %454 = vmatprep.subr.bf16.mxu1 %v597_v0  ;;  %v133_v36 = vsub.s32 0, %v695_v35  ;;  %v698_v37 = vld [vmem:[#allocation5] sm:$0x1f]  ;;  %v138_v38 = vsub.s32 1, %v695_v35  ;;  %v509_v47 = vld [vmem:[%s755_s3] sm:$0xff]   ;;  %v510_v48 = vld [vmem:[%s755_s3 + $0x8] sm:$0xff]  }
  0x2b   :  { %v511_v49 = vld [vmem:[%s755_s3 + $0x10] sm:$0xff]   ;;  %v512_v50 = vld [vmem:[%s755_s3 + $0x18] sm:$0xff]   ;;  %v513_v51 = vld [vmem:[%s755_s3 + $0x20] sm:$0xff]  }
  0x2c   :  { %v134_v39 = vrot.slane %v698_v37, %v133_v36  ;;  %v139_v42 = vrot.slane %v698_v37, %v138_v38  ;;  %v514_v52 = vld [vmem:[%s755_s3 + $0x28] sm:$0xff]   ;;  %v515_v53 = vld [vmem:[%s755_s3 + $0x30] sm:$0xff]   ;;  %v516_v54 = vld [vmem:[%s755_s3 + $0x38] sm:$0xff]   ;;  %s599_s3 = smov [#allocation7]  }
  0x2d   :  { %447 = vmatpush3.bf16.msra.mxu0 %v500_v2  ;;  %455 = vmatpush3.bf16.msra.mxu1 %v502_v6  ;;  %s394_s22 = sshll.u32 %s599_s3, 4  ;;  %s395_s22 = int_to_ptr.vmem [resolvable:$true] %s394_s22 }
  0x2e   :  { %472 = vmatprep.subr.bf16.mxu0 %v597_v0  ;;  %456 = vmatprep.subr.bf16.mxu1 %v597_v0  ;;  %s565_s0 = scalar_lea.vmem %s395_s22, 128  ;;  %p570_p3 = scmp.lt.s32.totalorder %s395_s22, %s395_s22 }
  0x2f   :  { %p566_p2 = scmp.ne.s32.totalorder %s395_s22, %s565_s0  ;;  %p571_p4 = scmp.lt.s32.totalorder %s565_s0, %s565_s0 }
  0x30   :  { %449 = vmatmul.mubr.msk.bf16.vlgmr.msra.gmra.mrb[0].mxu0 %vm67_vm1, %v54_v4 }
  0x31   :  { %488 = vmatprep.mubr.msk.bf16.mxu0 %vm598_vm0, %v597_v0  ;;  %457 = vmatpush3.bf16.msra.mxu1 %v503_v7  ;;  %p572_p5 = por %p571_p4, %p570_p3 }
  0x32   :  { %458 = vmatprep.subr.bf16.mxu1 %v597_v0  ;;  %473 = vmatpush3.bf16.msra.mxu0 %v509_v47 }
  0x33   :  { %474 = vmatprep.subr.bf16.mxu0 %v597_v0  ;;  %p573_p6 = pnand %p572_p5, %p566_p2 }
  0x35   :  { %459 = vmatpush3.bf16.msra.mxu1 %v504_v8 }
  0x36   :  { %460 = vmatprep.subr.bf16.mxu1 %v597_v0  ;;  %475 = vmatpush3.bf16.msra.mxu0 %v510_v48 }
  0x37   :  { %476 = vmatprep.subr.bf16.mxu0 %v597_v0 }
  0x39   :  { %461 = vmatpush3.bf16.msra.mxu1 %v505_v9 }
  0x3a   :  { %462 = vmatprep.subr.bf16.mxu1 %v597_v0  ;;  %477 = vmatpush3.bf16.msra.mxu0 %v511_v49 }
  0x3b   :  { %478 = vmatprep.subr.bf16.mxu0 %v597_v0 }
  0x3d   :  { %463 = vmatpush3.bf16.msra.mxu1 %v506_v10 }
  0x3e   :  { %464 = vmatprep.subr.bf16.mxu1 %v597_v0  ;;  %479 = vmatpush3.bf16.msra.mxu0 %v512_v50 }
  0x3f   :  { %480 = vmatprep.subr.bf16.mxu0 %v597_v0 }
  0x41   :  { %465 = vmatpush3.bf16.msra.mxu1 %v507_v11 }
  0x42   :  { %466 = vmatprep.subr.bf16.mxu1 %v597_v0  ;;  %481 = vmatpush3.bf16.msra.mxu0 %v513_v51 }
  0x43   :  { %482 = vmatprep.subr.bf16.mxu0 %v597_v0 }
  0x45   :  { %467 = vmatpush3.bf16.msra.mxu1 %v508_v12  ;;  %v268_v12 = vsub.s32 2, %v695_v35 }
  0x46   :  { %483 = vmatpush3.bf16.msra.mxu0 %v514_v52 }
  0x47   :  { %484 = vmatprep.subr.bf16.mxu0 %v597_v0 }
  0x4a   :  { %485 = vmatpush3.bf16.msra.mxu0 %v515_v53 }
  0x4b   :  { %486 = vmatprep.subr.bf16.mxu0 %v597_v0 }
  0x4e   :  { %487 = vmatpush3.bf16.msra.mxu0 %v516_v54 }
 0x103   :  { %v105_v13 = vpop.f32.mrb[0].mxu0 }
 0x104   :  { %v111_v14 = vrot.slane %v105_v13, 4  ;;  %v450_v15 = vpop.f32.mrb[1].mxu0 }
 0x105   :  { %v108_v16 = vpop.f32.mrb[2].mxu0 }
 0x106   :  { %v112_v17 = vadd.f32 %v111_v14, %v105_v13  ;;  %v451_v18 = vpop.f32.mrb[3].mxu0  ;;  %v269_v14 = vrot.slane %v698_v37, %v268_v12 }
 0x108   :  { %v113_v19 = vrot.slane %v112_v17, 2 }
 0x10a   :  { %v114_v20 = vadd.f32 %v113_v19, %v112_v17 }
 0x10c   :  { %v115_v21 = vrot.slane %v114_v20, 1 }
 0x10e   :  { %v116_v22 = vadd.f32 %v115_v21, %v114_v20 }
 0x110   :  { %v118_v23 = vmul.f32 0.125, %v116_v22  ;;  %v296_v22 = vsub.s32 4, %v695_v35 }
 0x112   :  { %v119_v24 = vsub.f32 %v105_v13, %v118_v23  ;;  %v273_v13 = vsub.s32 3, %v695_v35  ;;  %v297_v23 = vrot.slane %v698_v37, %v296_v22 }
 0x114   :  { %v120_v25 = vmul.f32 %v119_v24, %v119_v24  ;;  %v274_v17 = vrot.slane %v698_v37, %v273_v13 }
 0x116   :  { %v121_v26 = vrot.slane %v120_v25, 4 }
 0x118   :  { %v122_v27 = vadd.f32 %v121_v26, %v120_v25 }
 0x11a   :  { %v123_v28 = vrot.slane %v122_v27, 2 }
 0x11c   :  { %v124_v29 = vadd.f32 %v123_v28, %v122_v27 }
 0x11e   :  { %v125_v30 = vrot.slane %v124_v29, 1 }
 0x120   :  { %v126_v31 = vadd.f32 %v125_v30, %v124_v29 }
 0x122   :  { %v127_v32 = vmul.f32 0.125, %v126_v31 }
 0x124   :  { %v128_v34 = vadd.f32 1e-05, %v127_v32 }
 0x126   :  { %517 = vrsqrt.f32 %v128_v34 }
 0x130   :  { %v518_v40 = vpop.eup %517 }
 0x131   :  { %v130_v41 = vmul.f32 %v518_v40, %v119_v24 }
 0x133   :  { %v135_v43 = vmul.f32 %v134_v39, %v130_v41 }
 0x135   :  { %v140_v44 = vadd.f32 %v139_v42, %v135_v43 }
 0x137   :  { %v141_v45 = vmax.f32 %v140_v44, 0.0 }
 0x139   :  { %v158_v46 = vpack.c.bf16 %v141_v45, %v141_v45 }
 0x13b   :  { %469 = vmatmul.mubr.bf16.vlgmr.msra.gmra.mrb[0].mxu1 %v158_v46 }
 0x20e   :  { %v241_v55 = vpop.f32.mrb[0].mxu1 }
 0x20f   :  { %v247_v56 = vrot.slane %v241_v55, 4  ;;  %v470_v57 = vpop.f32.mrb[1].mxu1 }
 0x210   :  { %v244_v58 = vpop.f32.mrb[2].mxu1 }
 0x211   :  { %v248_v59 = vadd.f32 %v247_v56, %v241_v55  ;;  %v471_v60 = vpop.f32.mrb[3].mxu1 }
 0x213   :  { %v249_v61 = vrot.slane %v248_v59, 2 }
 0x215   :  { %v250_v62 = vadd.f32 %v249_v61, %v248_v59 }
 0x217   :  { %v251_v63 = vrot.slane %v250_v62, 1 }
 0x219   :  { %v252_v1 = vadd.f32 %v251_v63, %v250_v62 }
 0x21b   :  { %v253_v2 = vmul.f32 0.125, %v252_v1 }
 0x21d   :  { %v254_v3 = vsub.f32 %v241_v55, %v253_v2 }
 0x21f   :  { %v255_v4 = vmul.f32 %v254_v3, %v254_v3 }
 0x221   :  { %v256_v5 = vrot.slane %v255_v4, 4 }
 0x223   :  { %v257_v6 = vadd.f32 %v256_v5, %v255_v4 }
 0x225   :  { %v258_v7 = vrot.slane %v257_v6, 2 }
 0x227   :  { %v259_v8 = vadd.f32 %v258_v7, %v257_v6 }
 0x229   :  { %v260_v9 = vrot.slane %v259_v8, 1 }
 0x22b   :  { %v261_v0 = vadd.f32 %v260_v9, %v259_v8 }
 0x22d   :  { %v262_v10 = vmul.f32 0.125, %v261_v0 }
 0x22f   :  { %v263_v11 = vadd.f32 1e-05, %v262_v10 }
 0x231   :  { %519 = vrsqrt.f32 %v263_v11 }
 0x23b   :  { %v520_v15 = vpop.eup %519 }
 0x23c   :  { %v265_v16 = vmul.f32 %v520_v15, %v254_v3 }
 0x23e   :  { %v270_v18 = vmul.f32 %v269_v14, %v265_v16 }
 0x240   :  { %v275_v19 = vadd.f32 %v274_v17, %v270_v18 }
 0x242   :  { %v276_v20 = vmax.f32 %v275_v19, 0.0 }
 0x244   :  { %v293_v21 = vpack.c.bf16 %v276_v20, %v276_v20 }
 0x246   :  { %489 = vmatmul.mubr.bf16.vlgmr.msra.gmra.mrb[4].mxu0 %v293_v21 }
 0x319   :  { %v380_v24 = vpop.f32.mrb[4].mxu0 }
 0x31a   :  { %v381_v25 = vadd.f32 %v380_v24, %v297_v23  ;;  %v490_v26 = vpop.f32.mrb[5].mxu0 }
 0x31b   :  { %v383_v27 = vpop.f32.mrb[6].mxu0 }
 0x31c   :  { %v491_v28 = vpop.f32.mrb[7].mxu0  ;;  %387 = vst.msk [vmem:[#allocation7] sm:$0xff] %vm386_vm2, %v381_v25 }
 0x31d   :  { %576 = shalt.err (!%p573_p6)
}
 0x31e   :  { %s577_s25 = scalar_lea.hbm %s757_s5, 128 }
 0x31f   :  { %p578_p7 = scmp.ne.s32.totalorder %s757_s5, %s577_s25  ;;  %p581_p8 = scmp.lt.u32.totalorder %s577_s25, %s757_s5 }
 0x321   :  { %p583_p9 = pnand %p581_p8, %p578_p7 }
 0x323   :  { %586 = shalt.err (!%p583_p9)
}
 0x324   :  { %397 = dma.vmem_to_hbm [thread:$0]  %s395_s22, 128, %s757_s5, [#allocation4]  }
 0x325   :  { %591 = dma.done.wait [#allocation4], 128  }
 0x326   :  { %592 = vsyncadd [#allocation4], 4294967168 }
 0x327   :  { %401 = vsyncpa [#allocation3], 1 }
 0x328   :  { %402 = vsyncpa [#allocation6], 1 }
 0x329   :  { %403 = vsyncpa [#allocation4], 1 }

</bundles_post_ra>
